<compile_context>
chip_gen: v6e
topology: v6e:2x2x1
jax: 0.10.0
libtpu: 0.0.40
codegen_flags: <defaults>
</compile_context>

<pallas_src>
import jax
import jax.numpy as jnp
from jax.experimental import pallas as pl
from jax.experimental.pallas import tpu as pltpu


def _make_lstm_kernel(mxu_bf16: bool):
    """Build the LSTM kernel; `mxu_bf16` casts only the MXU dot operands."""

    def kernel(x_ref,      # (Bp, T)  input series (I == 1 squeezed), time on lanes
               wih_ref,    # (1, 4H)  W_ih^T row               (g-cols pre-scaled by 2)
               b_ref,      # (1, 4H)  b_ih + b_hh              (g-cols pre-scaled by 2)
               whh_ref,    # (H, 4H)  W_hh^T                   (g-cols pre-scaled by 2)
               ps_ref,     # (1, 4H)  post-sigmoid scale  (1, 1, 2, 1 per gate block)
               po_ref,     # (1, 4H)  post-sigmoid offset (0, 0, -1, 0 per gate block)
               wlin_ref,   # (1, H)   output-head weight row (O == 1)
               blin_ref,   # (1, 1)   output-head bias
               out_ref):   # (Bp, 1)
        Bp, T = x_ref.shape
        H, G = whh_ref.shape

        # Loop-invariant loads / broadcasts hoisted out of the unrolled
        # recurrence (JAX does not CSE broadcast_in_dim).
        whh = whh_ref[...]
        if mxu_bf16:
            whh = whh.astype(jnp.bfloat16)
        wih = jnp.broadcast_to(wih_ref[...], (Bp, G))
        b = jnp.broadcast_to(b_ref[...], (Bp, G))
        ps = jnp.broadcast_to(ps_ref[...], (Bp, G))
        po = jnp.broadcast_to(po_ref[...], (Bp, G))
        wlin = jnp.broadcast_to(wlin_ref[...], (Bp, H))
        x = x_ref[...]

        h = jnp.zeros((Bp, H), jnp.float32)
        c = jnp.zeros((Bp, H), jnp.float32)

        # Fully unrolled recurrence (T small & static); h/c never leave vregs.
        # TODO(synk): for long T switch to lax.fori_loop (modest unroll) or a
        # grid T axis to bound vreg live ranges / compile time.
        # TODO(synk): latch W_hh in the MXU weight registers across steps via
        # pltpu.matmul_push_rhs/matmul_acc_lhs/matmul_pop if the bundle dump
        # shows the loop-invariant RHS being re-streamed every vmatmul.
        for t in range(T):
            xt = x[:, t:t + 1]                                    # (Bp, 1)
            hh = h.astype(jnp.bfloat16) if mxu_bf16 else h
            # I == 1 input projection fused in-kernel: a broadcast multiply on
            # the VPU that rides under the MXU recurrence matmul.
            pre = (xt * wih + b
                   + jnp.dot(hh, whh, preferred_element_type=jnp.float32))
            # Single full-width sigmoid (one EUP pass): i/f/o blocks pass
            # through (scale 1, off 0); the g block becomes
            # 2*sigmoid(2z) - 1 == tanh(z) (the 2x pre-scale lives in the
            # weights/bias, applied once by prepare_params).
            act = jax.nn.sigmoid(pre) * ps + po
            i_g = act[:, 0 * H:1 * H]
            f_g = act[:, 1 * H:2 * H]
            g_g = act[:, 2 * H:3 * H]
            o_g = act[:, 3 * H:4 * H]
            c = f_g * c + i_g * g_g
            h = o_g * jnp.tanh(c)

        # Output head (O == 1): VPU multiply + lane reduce instead of an
        # N=1 MXU push on the epilogue.
        out_ref[...] = (jnp.sum(h * wlin, axis=-1, keepdims=True)
                        + blin_ref[...]).astype(out_ref.dtype)

    return kernel


def prepare_params(params):
    """One-time parameter preprocessing, hoisted out of the per-call path.

    Keeps the 2x g-gate pre-scale and the post-sigmoid affine (post_scale /
    post_off) defined in one place so they stay in sync.
    """
    f32 = jnp.float32
    H = params["w_hh"].shape[1]
    O = params["w_lin"].shape[0]
    I = params["w_ih"].shape[1]
    assert I == 1 and O == 1, (I, O)  # TODO(synk): general-I/O head variant

    ones = jnp.ones((H,), f32)
    zeros = jnp.zeros((H,), f32)
    # tanh(z) = 2*sigmoid(2z) - 1: fold the factor 2 of the g block into the
    # weights/bias; undo it after the sigmoid with a per-lane affine.
    gate_pre = jnp.concatenate([ones, ones, jnp.full((H,), 2.0, f32), ones])  # (4H,)

    return {
        "wih_row": (params["w_ih"].astype(f32) * gate_pre[:, None]).T,              # (1, 4H)
        "whh_t": (params["w_hh"].astype(f32) * gate_pre[:, None]).T,                # (H, 4H)
        "b_row": ((params["b_ih"] + params["b_hh"]).astype(f32) * gate_pre)[None],  # (1, 4H)
        "post_scale": gate_pre[None, :],                                            # (1, 4H)
        "post_off": jnp.concatenate(
            [zeros, zeros, jnp.full((H,), -1.0, f32), zeros])[None, :],             # (1, 4H)
        "wlin_row": params["w_lin"].astype(f32),                                    # (1, H)
        "blin": params["b_lin"].astype(f32)[None, :],                               # (1, 1)
    }


def stock_price_lstm_forward(x, prepared, *, mxu_bf16=False):
    """x: (B, T, 1) float32 (batch_first, like the PyTorch module)."""
    B, T, I = x.shape
    assert I == 1, "kernel fuses the I == 1 input projection"
    O = prepared["blin"].shape[1]

    # Pad the batch to a sublane multiple (8); padded rows run on zeros and
    # are sliced off below.
    Bp = max(8, ((B + 7) // 8) * 8)
    x2 = x[:, :, 0].astype(jnp.float32)            # (B, T), time on lanes
    if Bp != B:
        x2 = jnp.pad(x2, ((0, Bp - B), (0, 0)))

    vmem = pl.BlockSpec(memory_space=pltpu.MemorySpace.VMEM)
    out = pl.pallas_call(
        _make_lstm_kernel(mxu_bf16),
        out_shape=jax.ShapeDtypeStruct((Bp, O), jnp.float32),
        in_specs=[vmem] * 8,
        out_specs=vmem,
    )(x2, prepared["wih_row"], prepared["b_row"], prepared["whh_t"],
      prepared["post_scale"], prepared["post_off"],
      prepared["wlin_row"], prepared["blin"])
    return out[:B]


def init_params(key, input_size, hidden_size, output_size):
    """PyTorch-layout parameters with U(-1/sqrt(H), 1/sqrt(H)) init."""
    H = hidden_size
    bound = 1.0 / (H ** 0.5)
    keys = jax.random.split(key, 6)

    def u(k, shape):
        return jax.random.uniform(k, shape, jnp.float32, -bound, bound)

    return {
        "w_ih": u(keys[0], (4 * H, input_size)),   # nn.LSTM weight_ih_l0: (4H, I)
        "w_hh": u(keys[1], (4 * H, H)),            # nn.LSTM weight_hh_l0: (4H, H)
        "b_ih": u(keys[2], (4 * H,)),
        "b_hh": u(keys[3], (4 * H,)),
        "w_lin": u(keys[4], (output_size, H)),     # nn.Linear weight: (O, H)
        "b_lin": u(keys[5], (output_size,)),
    }


def reference_forward(x, params):
    """Pure-JAX reference of the same forward pass (correctness check)."""
    B, T, I = x.shape
    H = params["w_hh"].shape[1]
    wih_t = params["w_ih"].T
    whh_t = params["w_hh"].T
    b = params["b_ih"] + params["b_hh"]
    h = jnp.zeros((B, H), jnp.float32)
    c = jnp.zeros((B, H), jnp.float32)
    for t in range(T):
        gates = x[:, t, :] @ wih_t + h @ whh_t + b
        i_g = jax.nn.sigmoid(gates[:, 0 * H:1 * H])
        f_g = jax.nn.sigmoid(gates[:, 1 * H:2 * H])
        g_g = jnp.tanh(gates[:, 2 * H:3 * H])
        o_g = jax.nn.sigmoid(gates[:, 3 * H:4 * H])
        c = f_g * c + i_g * g_g
        h = o_g * jnp.tanh(c)
    return h @ params["w_lin"].T + params["b_lin"][None, :]


if __name__ == "__main__":
    B, T = 2, 8
    INPUT_SIZE, HIDDEN, OUTPUT_SIZE = 1, 64, 1

    key = jax.random.PRNGKey(0)
    k_params, k_x = jax.random.split(key)
    params = init_params(k_params, INPUT_SIZE, HIDDEN, OUTPUT_SIZE)
    x = jax.random.normal(k_x, (B, T, INPUT_SIZE), jnp.float32)

    # One-time parameter prep (hoisted out of the per-call path).
    prepared = prepare_params(params)

    fwd = jax.jit(stock_price_lstm_forward, static_argnames=("mxu_bf16",))

    # f32 path: bit-for-bit comparable to the f32 reference within 1e-4.
    out = jax.block_until_ready(fwd(x, prepared, mxu_bf16=False))
    ref = reference_forward(x, params)
    assert out.shape == (B, OUTPUT_SIZE), out.shape
    assert jnp.allclose(out, ref, atol=1e-4, rtol=1e-4), (out, ref)

    # bf16 MXU-operand variant (v6e/v7x throughput win); gate math stays f32,
    # so it only matches the f32 reference at a relaxed tolerance -- just check
    # it compiles, runs and stays finite here.
    out_bf16 = jax.block_until_ready(fwd(x, prepared, mxu_bf16=True))
    assert out_bf16.shape == (B, OUTPUT_SIZE), out_bf16.shape
    assert bool(jnp.all(jnp.isfinite(out_bf16)))

    print("KERNEL_OK")
</pallas_src>

<mosaic_0001>
module attributes {stable_mosaic.version = 11 : i64} {
  func.func @kernel(%arg0: memref<8x8xf32, #tpu.memory_space<vmem>>, %arg1: memref<1x256xf32, #tpu.memory_space<vmem>>, %arg2: memref<1x256xf32, #tpu.memory_space<vmem>>, %arg3: memref<64x256xf32, #tpu.memory_space<vmem>>, %arg4: memref<1x256xf32, #tpu.memory_space<vmem>>, %arg5: memref<1x256xf32, #tpu.memory_space<vmem>>, %arg6: memref<1x64xf32, #tpu.memory_space<vmem>>, %arg7: memref<1x1xf32, #tpu.memory_space<vmem>>, %arg8: memref<8x1xf32, #tpu.memory_space<vmem>>) attributes {dimension_semantics = [], scalar_prefetch = 0 : i64, scratch_operands = 0 : i64, tpu.core_type = #tpu.core_type<tc>} {
    %c0 = arith.constant 0 : index
    %c0_0 = arith.constant 0 : index
    %0 = vector.load %arg3[%c0, %c0_0] : memref<64x256xf32, #tpu.memory_space<vmem>>, vector<64x256xf32>
    %c0_1 = arith.constant 0 : index
    %c0_2 = arith.constant 0 : index
    %1 = vector.load %arg1[%c0_1, %c0_2] : memref<1x256xf32, #tpu.memory_space<vmem>>, vector<1x256xf32>
    %2 = vector.shape_cast %1 : vector<1x256xf32> to vector<1x256xf32>
    %3 = vector.broadcast %2 : vector<1x256xf32> to vector<8x256xf32>
    %c0_3 = arith.constant 0 : index
    %c0_4 = arith.constant 0 : index
    %4 = vector.load %arg2[%c0_3, %c0_4] : memref<1x256xf32, #tpu.memory_space<vmem>>, vector<1x256xf32>
    %5 = vector.shape_cast %4 : vector<1x256xf32> to vector<1x256xf32>
    %6 = vector.broadcast %5 : vector<1x256xf32> to vector<8x256xf32>
    %c0_5 = arith.constant 0 : index
    %c0_6 = arith.constant 0 : index
    %7 = vector.load %arg4[%c0_5, %c0_6] : memref<1x256xf32, #tpu.memory_space<vmem>>, vector<1x256xf32>
    %8 = vector.shape_cast %7 : vector<1x256xf32> to vector<1x256xf32>
    %9 = vector.broadcast %8 : vector<1x256xf32> to vector<8x256xf32>
    %c0_7 = arith.constant 0 : index
    %c0_8 = arith.constant 0 : index
    %10 = vector.load %arg5[%c0_7, %c0_8] : memref<1x256xf32, #tpu.memory_space<vmem>>, vector<1x256xf32>
    %11 = vector.shape_cast %10 : vector<1x256xf32> to vector<1x256xf32>
    %12 = vector.broadcast %11 : vector<1x256xf32> to vector<8x256xf32>
    %c0_9 = arith.constant 0 : index
    %c0_10 = arith.constant 0 : index
    %13 = vector.load %arg6[%c0_9, %c0_10] : memref<1x64xf32, #tpu.memory_space<vmem>>, vector<1x64xf32>
    %14 = vector.shape_cast %13 : vector<1x64xf32> to vector<1x64xf32>
    %15 = vector.broadcast %14 : vector<1x64xf32> to vector<8x64xf32>
    %c0_11 = arith.constant 0 : index
    %c0_12 = arith.constant 0 : index
    %16 = vector.load %arg0[%c0_11, %c0_12] : memref<8x8xf32, #tpu.memory_space<vmem>>, vector<8x8xf32>
    %cst = arith.constant 0.000000e+00 : f32
    %17 = vector.broadcast %cst : f32 to vector<8x64xf32>
    %cst_13 = arith.constant 0.000000e+00 : f32
    %18 = vector.broadcast %cst_13 : f32 to vector<8x64xf32>
    %19 = vector.extract_strided_slice %16 {offsets = [0, 0], sizes = [8, 1], strides = [1, 1]} : vector<8x8xf32> to vector<8x1xf32>
    %20 = vector.broadcast %19 : vector<8x1xf32> to vector<8x256xf32>
    %21 = arith.mulf %20, %3 : vector<8x256xf32>
    %22 = arith.addf %21, %6 : vector<8x256xf32>
    %cst_14 = arith.constant dense<0.000000e+00> : vector<8x256xf32>
    %23 = tpu.matmul %17, %0, %cst_14 {dimension_numbers = #tpu.dot_dimension_numbers<[1], [0], [0], [1], [0, 0, 1, 1], [], []>} : vector<8x64xf32>, vector<64x256xf32>, vector<8x256xf32> -> vector<8x256xf32>
    %24 = arith.addf %22, %23 : vector<8x256xf32>
    %25 = arith.negf %24 : vector<8x256xf32>
    %26 = math.exp %25 : vector<8x256xf32>
    %cst_15 = arith.constant 1.000000e+00 : f32
    %27 = vector.broadcast %cst_15 : f32 to vector<8x256xf32>
    %28 = arith.addf %27, %26 : vector<8x256xf32>
    %29 = arith.divf %27, %28 : vector<8x256xf32>
    %30 = arith.mulf %29, %9 : vector<8x256xf32>
    %31 = arith.addf %30, %12 : vector<8x256xf32>
    %32 = vector.extract_strided_slice %31 {offsets = [0, 0], sizes = [8, 64], strides = [1, 1]} : vector<8x256xf32> to vector<8x64xf32>
    %33 = vector.extract_strided_slice %31 {offsets = [0, 64], sizes = [8, 64], strides = [1, 1]} : vector<8x256xf32> to vector<8x64xf32>
    %34 = vector.extract_strided_slice %31 {offsets = [0, 128], sizes = [8, 64], strides = [1, 1]} : vector<8x256xf32> to vector<8x64xf32>
    %35 = vector.extract_strided_slice %31 {offsets = [0, 192], sizes = [8, 64], strides = [1, 1]} : vector<8x256xf32> to vector<8x64xf32>
    %36 = arith.mulf %33, %18 : vector<8x64xf32>
    %37 = arith.mulf %32, %34 : vector<8x64xf32>
    %38 = arith.addf %36, %37 : vector<8x64xf32>
    %39 = math.tanh %38 : vector<8x64xf32>
    %40 = arith.mulf %35, %39 : vector<8x64xf32>
    %41 = vector.extract_strided_slice %16 {offsets = [0, 1], sizes = [8, 1], strides = [1, 1]} : vector<8x8xf32> to vector<8x1xf32>
    %42 = vector.broadcast %41 : vector<8x1xf32> to vector<8x256xf32>
    %43 = arith.mulf %42, %3 : vector<8x256xf32>
    %44 = arith.addf %43, %6 : vector<8x256xf32>
    %cst_16 = arith.constant dense<0.000000e+00> : vector<8x256xf32>
    %45 = tpu.matmul %40, %0, %cst_16 {dimension_numbers = #tpu.dot_dimension_numbers<[1], [0], [0], [1], [0, 0, 1, 1], [], []>} : vector<8x64xf32>, vector<64x256xf32>, vector<8x256xf32> -> vector<8x256xf32>
    %46 = arith.addf %44, %45 : vector<8x256xf32>
    %47 = arith.negf %46 : vector<8x256xf32>
    %48 = math.exp %47 : vector<8x256xf32>
    %cst_17 = arith.constant 1.000000e+00 : f32
    %49 = vector.broadcast %cst_17 : f32 to vector<8x256xf32>
    %50 = arith.addf %49, %48 : vector<8x256xf32>
    %51 = arith.divf %49, %50 : vector<8x256xf32>
    %52 = arith.mulf %51, %9 : vector<8x256xf32>
    %53 = arith.addf %52, %12 : vector<8x256xf32>
    %54 = vector.extract_strided_slice %53 {offsets = [0, 0], sizes = [8, 64], strides = [1, 1]} : vector<8x256xf32> to vector<8x64xf32>
    %55 = vector.extract_strided_slice %53 {offsets = [0, 64], sizes = [8, 64], strides = [1, 1]} : vector<8x256xf32> to vector<8x64xf32>
    %56 = vector.extract_strided_slice %53 {offsets = [0, 128], sizes = [8, 64], strides = [1, 1]} : vector<8x256xf32> to vector<8x64xf32>
    %57 = vector.extract_strided_slice %53 {offsets = [0, 192], sizes = [8, 64], strides = [1, 1]} : vector<8x256xf32> to vector<8x64xf32>
    %58 = arith.mulf %55, %38 : vector<8x64xf32>
    %59 = arith.mulf %54, %56 : vector<8x64xf32>
    %60 = arith.addf %58, %59 : vector<8x64xf32>
    %61 = math.tanh %60 : vector<8x64xf32>
    %62 = arith.mulf %57, %61 : vector<8x64xf32>
    %63 = vector.extract_strided_slice %16 {offsets = [0, 2], sizes = [8, 1], strides = [1, 1]} : vector<8x8xf32> to vector<8x1xf32>
    %64 = vector.broadcast %63 : vector<8x1xf32> to vector<8x256xf32>
    %65 = arith.mulf %64, %3 : vector<8x256xf32>
    %66 = arith.addf %65, %6 : vector<8x256xf32>
    %cst_18 = arith.constant dense<0.000000e+00> : vector<8x256xf32>
    %67 = tpu.matmul %62, %0, %cst_18 {dimension_numbers = #tpu.dot_dimension_numbers<[1], [0], [0], [1], [0, 0, 1, 1], [], []>} : vector<8x64xf32>, vector<64x256xf32>, vector<8x256xf32> -> vector<8x256xf32>
    %68 = arith.addf %66, %67 : vector<8x256xf32>
    %69 = arith.negf %68 : vector<8x256xf32>
    %70 = math.exp %69 : vector<8x256xf32>
    %cst_19 = arith.constant 1.000000e+00 : f32
    %71 = vector.broadcast %cst_19 : f32 to vector<8x256xf32>
    %72 = arith.addf %71, %70 : vector<8x256xf32>
    %73 = arith.divf %71, %72 : vector<8x256xf32>
    %74 = arith.mulf %73, %9 : vector<8x256xf32>
    %75 = arith.addf %74, %12 : vector<8x256xf32>
    %76 = vector.extract_strided_slice %75 {offsets = [0, 0], sizes = [8, 64], strides = [1, 1]} : vector<8x256xf32> to vector<8x64xf32>
    %77 = vector.extract_strided_slice %75 {offsets = [0, 64], sizes = [8, 64], strides = [1, 1]} : vector<8x256xf32> to vector<8x64xf32>
    %78 = vector.extract_strided_slice %75 {offsets = [0, 128], sizes = [8, 64], strides = [1, 1]} : vector<8x256xf32> to vector<8x64xf32>
    %79 = vector.extract_strided_slice %75 {offsets = [0, 192], sizes = [8, 64], strides = [1, 1]} : vector<8x256xf32> to vector<8x64xf32>
    %80 = arith.mulf %77, %60 : vector<8x64xf32>
    %81 = arith.mulf %76, %78 : vector<8x64xf32>
    %82 = arith.addf %80, %81 : vector<8x64xf32>
    %83 = math.tanh %82 : vector<8x64xf32>
    %84 = arith.mulf %79, %83 : vector<8x64xf32>
    %85 = vector.extract_strided_slice %16 {offsets = [0, 3], sizes = [8, 1], strides = [1, 1]} : vector<8x8xf32> to vector<8x1xf32>
    %86 = vector.broadcast %85 : vector<8x1xf32> to vector<8x256xf32>
    %87 = arith.mulf %86, %3 : vector<8x256xf32>
    %88 = arith.addf %87, %6 : vector<8x256xf32>
    %cst_20 = arith.constant dense<0.000000e+00> : vector<8x256xf32>
    %89 = tpu.matmul %84, %0, %cst_20 {dimension_numbers = #tpu.dot_dimension_numbers<[1], [0], [0], [1], [0, 0, 1, 1], [], []>} : vector<8x64xf32>, vector<64x256xf32>, vector<8x256xf32> -> vector<8x256xf32>
    %90 = arith.addf %88, %89 : vector<8x256xf32>
    %91 = arith.negf %90 : vector<8x256xf32>
    %92 = math.exp %91 : vector<8x256xf32>
    %cst_21 = arith.constant 1.000000e+00 : f32
    %93 = vector.broadcast %cst_21 : f32 to vector<8x256xf32>
    %94 = arith.addf %93, %92 : vector<8x256xf32>
    %95 = arith.divf %93, %94 : vector<8x256xf32>
    %96 = arith.mulf %95, %9 : vector<8x256xf32>
    %97 = arith.addf %96, %12 : vector<8x256xf32>
    %98 = vector.extract_strided_slice %97 {offsets = [0, 0], sizes = [8, 64], strides = [1, 1]} : vector<8x256xf32> to vector<8x64xf32>
    %99 = vector.extract_strided_slice %97 {offsets = [0, 64], sizes = [8, 64], strides = [1, 1]} : vector<8x256xf32> to vector<8x64xf32>
    %100 = vector.extract_strided_slice %97 {offsets = [0, 128], sizes = [8, 64], strides = [1, 1]} : vector<8x256xf32> to vector<8x64xf32>
    %101 = vector.extract_strided_slice %97 {offsets = [0, 192], sizes = [8, 64], strides = [1, 1]} : vector<8x256xf32> to vector<8x64xf32>
    %102 = arith.mulf %99, %82 : vector<8x64xf32>
    %103 = arith.mulf %98, %100 : vector<8x64xf32>
    %104 = arith.addf %102, %103 : vector<8x64xf32>
    %105 = math.tanh %104 : vector<8x64xf32>
    %106 = arith.mulf %101, %105 : vector<8x64xf32>
    %107 = vector.extract_strided_slice %16 {offsets = [0, 4], sizes = [8, 1], strides = [1, 1]} : vector<8x8xf32> to vector<8x1xf32>
    %108 = vector.broadcast %107 : vector<8x1xf32> to vector<8x256xf32>
    %109 = arith.mulf %108, %3 : vector<8x256xf32>
    %110 = arith.addf %109, %6 : vector<8x256xf32>
    %cst_22 = arith.constant dense<0.000000e+00> : vector<8x256xf32>
    %111 = tpu.matmul %106, %0, %cst_22 {dimension_numbers = #tpu.dot_dimension_numbers<[1], [0], [0], [1], [0, 0, 1, 1], [], []>} : vector<8x64xf32>, vector<64x256xf32>, vector<8x256xf32> -> vector<8x256xf32>
    %112 = arith.addf %110, %111 : vector<8x256xf32>
    %113 = arith.negf %112 : vector<8x256xf32>
    %114 = math.exp %113 : vector<8x256xf32>
    %cst_23 = arith.constant 1.000000e+00 : f32
    %115 = vector.broadcast %cst_23 : f32 to vector<8x256xf32>
    %116 = arith.addf %115, %114 : vector<8x256xf32>
    %117 = arith.divf %115, %116 : vector<8x256xf32>
    %118 = arith.mulf %117, %9 : vector<8x256xf32>
    %119 = arith.addf %118, %12 : vector<8x256xf32>
    %120 = vector.extract_strided_slice %119 {offsets = [0, 0], sizes = [8, 64], strides = [1, 1]} : vector<8x256xf32> to vector<8x64xf32>
    %121 = vector.extract_strided_slice %119 {offsets = [0, 64], sizes = [8, 64], strides = [1, 1]} : vector<8x256xf32> to vector<8x64xf32>
    %122 = vector.extract_strided_slice %119 {offsets = [0, 128], sizes = [8, 64], strides = [1, 1]} : vector<8x256xf32> to vector<8x64xf32>
    %123 = vector.extract_strided_slice %119 {offsets = [0, 192], sizes = [8, 64], strides = [1, 1]} : vector<8x256xf32> to vector<8x64xf32>
    %124 = arith.mulf %121, %104 : vector<8x64xf32>
    %125 = arith.mulf %120, %122 : vector<8x64xf32>
    %126 = arith.addf %124, %125 : vector<8x64xf32>
    %127 = math.tanh %126 : vector<8x64xf32>
    %128 = arith.mulf %123, %127 : vector<8x64xf32>
    %129 = vector.extract_strided_slice %16 {offsets = [0, 5], sizes = [8, 1], strides = [1, 1]} : vector<8x8xf32> to vector<8x1xf32>
    %130 = vector.broadcast %129 : vector<8x1xf32> to vector<8x256xf32>
    %131 = arith.mulf %130, %3 : vector<8x256xf32>
    %132 = arith.addf %131, %6 : vector<8x256xf32>
    %cst_24 = arith.constant dense<0.000000e+00> : vector<8x256xf32>
    %133 = tpu.matmul %128, %0, %cst_24 {dimension_numbers = #tpu.dot_dimension_numbers<[1], [0], [0], [1], [0, 0, 1, 1], [], []>} : vector<8x64xf32>, vector<64x256xf32>, vector<8x256xf32> -> vector<8x256xf32>
    %134 = arith.addf %132, %133 : vector<8x256xf32>
    %135 = arith.negf %134 : vector<8x256xf32>
    %136 = math.exp %135 : vector<8x256xf32>
    %cst_25 = arith.constant 1.000000e+00 : f32
    %137 = vector.broadcast %cst_25 : f32 to vector<8x256xf32>
    %138 = arith.addf %137, %136 : vector<8x256xf32>
    %139 = arith.divf %137, %138 : vector<8x256xf32>
    %140 = arith.mulf %139, %9 : vector<8x256xf32>
    %141 = arith.addf %140, %12 : vector<8x256xf32>
    %142 = vector.extract_strided_slice %141 {offsets = [0, 0], sizes = [8, 64], strides = [1, 1]} : vector<8x256xf32> to vector<8x64xf32>
    %143 = vector.extract_strided_slice %141 {offsets = [0, 64], sizes = [8, 64], strides = [1, 1]} : vector<8x256xf32> to vector<8x64xf32>
    %144 = vector.extract_strided_slice %141 {offsets = [0, 128], sizes = [8, 64], strides = [1, 1]} : vector<8x256xf32> to vector<8x64xf32>
    %145 = vector.extract_strided_slice %141 {offsets = [0, 192], sizes = [8, 64], strides = [1, 1]} : vector<8x256xf32> to vector<8x64xf32>
    %146 = arith.mulf %143, %126 : vector<8x64xf32>
    %147 = arith.mulf %142, %144 : vector<8x64xf32>
    %148 = arith.addf %146, %147 : vector<8x64xf32>
    %149 = math.tanh %148 : vector<8x64xf32>
    %150 = arith.mulf %145, %149 : vector<8x64xf32>
    %151 = vector.extract_strided_slice %16 {offsets = [0, 6], sizes = [8, 1], strides = [1, 1]} : vector<8x8xf32> to vector<8x1xf32>
    %152 = vector.broadcast %151 : vector<8x1xf32> to vector<8x256xf32>
    %153 = arith.mulf %152, %3 : vector<8x256xf32>
    %154 = arith.addf %153, %6 : vector<8x256xf32>
    %cst_26 = arith.constant dense<0.000000e+00> : vector<8x256xf32>
    %155 = tpu.matmul %150, %0, %cst_26 {dimension_numbers = #tpu.dot_dimension_numbers<[1], [0], [0], [1], [0, 0, 1, 1], [], []>} : vector<8x64xf32>, vector<64x256xf32>, vector<8x256xf32> -> vector<8x256xf32>
    %156 = arith.addf %154, %155 : vector<8x256xf32>
    %157 = arith.negf %156 : vector<8x256xf32>
    %158 = math.exp %157 : vector<8x256xf32>
    %cst_27 = arith.constant 1.000000e+00 : f32
    %159 = vector.broadcast %cst_27 : f32 to vector<8x256xf32>
    %160 = arith.addf %159, %158 : vector<8x256xf32>
    %161 = arith.divf %159, %160 : vector<8x256xf32>
    %162 = arith.mulf %161, %9 : vector<8x256xf32>
    %163 = arith.addf %162, %12 : vector<8x256xf32>
    %164 = vector.extract_strided_slice %163 {offsets = [0, 0], sizes = [8, 64], strides = [1, 1]} : vector<8x256xf32> to vector<8x64xf32>
    %165 = vector.extract_strided_slice %163 {offsets = [0, 64], sizes = [8, 64], strides = [1, 1]} : vector<8x256xf32> to vector<8x64xf32>
    %166 = vector.extract_strided_slice %163 {offsets = [0, 128], sizes = [8, 64], strides = [1, 1]} : vector<8x256xf32> to vector<8x64xf32>
    %167 = vector.extract_strided_slice %163 {offsets = [0, 192], sizes = [8, 64], strides = [1, 1]} : vector<8x256xf32> to vector<8x64xf32>
    %168 = arith.mulf %165, %148 : vector<8x64xf32>
    %169 = arith.mulf %164, %166 : vector<8x64xf32>
    %170 = arith.addf %168, %169 : vector<8x64xf32>
    %171 = math.tanh %170 : vector<8x64xf32>
    %172 = arith.mulf %167, %171 : vector<8x64xf32>
    %173 = vector.extract_strided_slice %16 {offsets = [0, 7], sizes = [8, 1], strides = [1, 1]} : vector<8x8xf32> to vector<8x1xf32>
    %174 = vector.broadcast %173 : vector<8x1xf32> to vector<8x256xf32>
    %175 = arith.mulf %174, %3 : vector<8x256xf32>
    %176 = arith.addf %175, %6 : vector<8x256xf32>
    %cst_28 = arith.constant dense<0.000000e+00> : vector<8x256xf32>
    %177 = tpu.matmul %172, %0, %cst_28 {dimension_numbers = #tpu.dot_dimension_numbers<[1], [0], [0], [1], [0, 0, 1, 1], [], []>} : vector<8x64xf32>, vector<64x256xf32>, vector<8x256xf32> -> vector<8x256xf32>
    %178 = arith.addf %176, %177 : vector<8x256xf32>
    %179 = arith.negf %178 : vector<8x256xf32>
    %180 = math.exp %179 : vector<8x256xf32>
    %cst_29 = arith.constant 1.000000e+00 : f32
    %181 = vector.broadcast %cst_29 : f32 to vector<8x256xf32>
    %182 = arith.addf %181, %180 : vector<8x256xf32>
    %183 = arith.divf %181, %182 : vector<8x256xf32>
    %184 = arith.mulf %183, %9 : vector<8x256xf32>
    %185 = arith.addf %184, %12 : vector<8x256xf32>
    %186 = vector.extract_strided_slice %185 {offsets = [0, 0], sizes = [8, 64], strides = [1, 1]} : vector<8x256xf32> to vector<8x64xf32>
    %187 = vector.extract_strided_slice %185 {offsets = [0, 64], sizes = [8, 64], strides = [1, 1]} : vector<8x256xf32> to vector<8x64xf32>
    %188 = vector.extract_strided_slice %185 {offsets = [0, 128], sizes = [8, 64], strides = [1, 1]} : vector<8x256xf32> to vector<8x64xf32>
    %189 = vector.extract_strided_slice %185 {offsets = [0, 192], sizes = [8, 64], strides = [1, 1]} : vector<8x256xf32> to vector<8x64xf32>
    %190 = arith.mulf %187, %170 : vector<8x64xf32>
    %191 = arith.mulf %186, %188 : vector<8x64xf32>
    %192 = arith.addf %190, %191 : vector<8x64xf32>
    %193 = math.tanh %192 : vector<8x64xf32>
    %194 = arith.mulf %189, %193 : vector<8x64xf32>
    %195 = arith.mulf %194, %15 : vector<8x64xf32>
    %cst_30 = arith.constant dense<0.000000e+00> : vector<8xf32>
    %196 = vector.multi_reduction <add>, %195, %cst_30 [1] : vector<8x64xf32> to vector<8xf32>
    %197 = vector.shape_cast %196 : vector<8xf32> to vector<8x1xf32>
    %c0_31 = arith.constant 0 : index
    %c0_32 = arith.constant 0 : index
    %198 = vector.load %arg7[%c0_31, %c0_32] : memref<1x1xf32, #tpu.memory_space<vmem>>, vector<1x1xf32>
    %199 = vector.broadcast %198 : vector<1x1xf32> to vector<8x1xf32>
    %200 = arith.addf %197, %199 : vector<8x1xf32>
    %c0_33 = arith.constant 0 : index
    %c0_34 = arith.constant 0 : index
    %201 = vector.load %arg8[%c0_33, %c0_34] : memref<8x1xf32, #tpu.memory_space<vmem>>, vector<8x1xf32>
    tpu.vector_store %arg8[%c0_33, %c0_34], %200 {strides = array<i32>} : memref<8x1xf32, #tpu.memory_space<vmem>>, vector<8x1xf32>,
    return
  }
}

</mosaic_0001>

<bundles_post_ra>
// kernel: stock_price_lstm_forward.1
= control target key start
LH: loop header
LB: loop body
LE: loop exit
PB: predicated region body
PF: predicated region fallthrough
CT: control target
= control target key end

     0   :  { %s1547_s0 = inlined_call_operand.vmem [shape: f32[8,8], index: 0, kind: input, shape index: {}]   ;;  %s1548_s1 = inlined_call_operand.vmem [shape: f32[1,256], index: 1, kind: input, shape index: {}]   ;;  %s1549_s2 = inlined_call_operand.vmem [shape: f32[1,256], index: 2, kind: input, shape index: {}]   ;;  %s1550_s3 = inlined_call_operand.hbm [shape: f32[64,256], index: 3, kind: input, shape index: {}]   ;;  %s1551_s4 = inlined_call_operand.vmem [shape: f32[1,256], index: 4, kind: input, shape index: {}]   ;;  %s1552_s5 = inlined_call_operand.vmem [shape: f32[1,256], index: 5, kind: input, shape index: {}]   ;;  %s1553_s6 = inlined_call_operand.vmem [shape: f32[1,64], index: 6, kind: input, shape index: {}]   ;;  %s1554_s7 = inlined_call_operand.<no memory space> [shape: f32[1,1], index: 7, kind: input, shape index: {}]   ;;  %s1555_s8 = inlined_call_operand.vmem [shape: f32[8,1], index: 8, kind: output, shape index: {}]  }
   0x1   :  { %v13_v0 = vstv %s1554_s7 }
   0x2   :  { %14 = vst [vmem:[#allocation2] sm:$0x1] %v13_v0 }
   0x3   :  { %15 = vsyncpa [#allocation4], 0  ;;  %s1178_s29 = smov [#allocation3]  }
   0x4   :  { %s27_s30 = sshll.u32 %s1178_s29, 4  ;;  %s28_s30 = int_to_ptr.vmem [resolvable:$true] %s27_s30 }
   0x5   :  { %s1164_s9 = scalar_lea.vmem %s28_s30, 2048  ;;  %p1169_p1 = scmp.lt.s32.totalorder %s28_s30, %s28_s30 }
   0x6   :  { %p1165_p0 = scmp.ne.s32.totalorder %s28_s30, %s1164_s9  ;;  %p1170_p2 = scmp.lt.s32.totalorder %s1164_s9, %s1164_s9 }
   0x8   :  { %p1171_p3 = por %p1170_p2, %p1169_p1 }
   0xa   :  { %p1172_p4 = pnand %p1171_p3, %p1165_p0 }
   0xc   :  { %1175 = shalt.err (!%p1172_p4)
}
   0xd   :  { %s1179_s10 = smov 256   ;;  %s1180_s11 = smov 16  }
   0xe   :  { %33 = dma.hbm_to_vmem [thread:$0]  %s1550_s3, 2048, %s28_s30, [#allocation4], %s1179_s10, %s1179_s10, %s1180_s11  }
   0xf   :  { %1176 = dma.done.wait [#allocation4], 2048  }
  0x10   :  { %1177 = vsyncadd [#allocation4], 4294965248  ;;  %v1181_v1 = vmov 0.0   ;;  %v1182_v2 = vmov 0   ;;  %v1244_v3 = vld [vmem:[#allocation3 + $0x78] sm:$0xff]  ;;  %v1246_v4 = vld [vmem:[#allocation3 + $0x70] sm:$0xff]  ;;  %v63_v20 = vlaneseq }
  0x11   :  { %193 = vmatprep.mubr.f32.mxu0 %v1181_v1  ;;  %1068 = vset.pattern.permute.xlu0 %v1182_v2  ;;  %v1248_v5 = vld [vmem:[#allocation3 + $0x68] sm:$0xff]  ;;  %v1251_v6 = vld [vmem:[#allocation3 + $0x60] sm:$0xff]  ;;  %v1255_v7 = vld [vmem:[#allocation3 + $0x58] sm:$0xff]  ;;  %v1184_v61 = vmov 1   ;;  %vm125_vm0 = vcmask 523264   ;;  %vm1023_vm1 = vcmask 7168  }
  0x12   :  { %304 = vmatprep.mubr.f32.mxu1 %v1181_v1  ;;  %145 = vmatprep.subr.mxu0 %v1244_v3  ;;  %v1259_v8 = vld [vmem:[#allocation3 + $0x50] sm:$0xff]  ;;  %v1263_v9 = vld [vmem:[#allocation3 + $0x48] sm:$0xff]  ;;  %v1267_v10 = vld [vmem:[#allocation3 + $0x40] sm:$0xff]  ;;  %v64_v21 = vshrl.u32 %v63_v20, 7 }
  0x13   :  { %256 = vmatprep.subr.mxu1 %v1244_v3  ;;  %146 = vmatpush1.msra.mxu0 %v1246_v4  ;;  %v1272_v11 = vld [vmem:[%s1547_s0] sm:$0xff]  ;;  %v1280_v13 = vld [vmem:[#allocation3 + $0x30] sm:$0xff]  ;;  %v1284_v14 = vld [vmem:[#allocation3 + $0x28] sm:$0xff] }
  0x14   :  { %257 = vmatpush1.msra.mxu1 %v1246_v4  ;;  %147 = vmatprep.subr.mxu0 %v1248_v5  ;;  %v1276_v12 = vld [vmem:[#allocation3 + $0x38] sm:$0xff]  ;;  %v1288_v15 = vld [vmem:[#allocation3 + $0x20] sm:$0xff]  ;;  %v1296_v17 = vld [vmem:[#allocation3 + $0x10] sm:$0xff]  ;;  %v65_v22 = vsub.s32 0, %v64_v21  ;;  %v69_v24 = vsub.s32 1, %v64_v21 }
  0x15   :  { %258 = vmatprep.subr.mxu1 %v1248_v5  ;;  %148 = vmatpush1.msra.mxu0 %v1251_v6  ;;  %v1292_v16 = vld [vmem:[#allocation3 + $0x18] sm:$0xff]  ;;  %v1300_v18 = vld [vmem:[#allocation3 + $0x8] sm:$0xff]  ;;  %v1304_v19 = vld [vmem:[#allocation3] sm:$0xff] }
  0x16   :  { %259 = vmatpush1.msra.mxu1 %v1251_v6  ;;  %149 = vmatprep.subr.mxu0 %v1255_v7  ;;  %v61_v23 = vld [vmem:[%s1548_s1] sm:$0x3] }
  0x17   :  { %260 = vmatprep.subr.mxu1 %v1255_v7  ;;  %150 = vmatpush1.msra.mxu0 %v1259_v8  ;;  %v1337_v25 = vrot.slane %v61_v23, %v65_v22  ;;  %v73_v27 = vld [vmem:[%s1549_s2] sm:$0x3]  ;;  %v1342_v28 = vrot.slane %v61_v23, %v69_v24 }
  0x18   :  { %118 = vperm.xlu0 %1068, %v1272_v11   ;;  %151 = vmatprep.subr.mxu0 %v1263_v9  ;;  %v1345_v30 = vrot.slane %v73_v27, %v65_v22  ;;  %v1348_v32 = vrot.slane %v73_v27, %v69_v24  ;;  %v85_v45 = vld [vmem:[%s1551_s4] sm:$0x3]  ;;  %s1183_s4 = smov 64  }
  0x19   :  { %261 = vmatpush1.msra.mxu1 %v1259_v8  ;;  %152 = vmatpush1.msra.mxu0 %v1267_v10  ;;  %v1355_v46 = vrot.slane %v85_v45, %v65_v22  ;;  %v97_v47 = vld [vmem:[%s1552_s5] sm:$0x3]  ;;  %v1360_v48 = vrot.slane %v85_v45, %v69_v24 }
  0x1a   :  { %262 = vmatprep.subr.mxu1 %v1263_v9  ;;  %153 = vmatprep.subr.mxu0 %v1276_v12  ;;  %v1362_v50 = vrot.slane %v97_v47, %v65_v22  ;;  %v1364_v51 = vrot.slane %v97_v47, %v69_v24 }
  0x1b   :  { %263 = vmatpush1.msra.mxu1 %v1267_v10  ;;  %154 = vmatpush1.msra.mxu0 %v1280_v13 }
  0x1c   :  { %264 = vmatprep.subr.mxu1 %v1276_v12  ;;  %155 = vmatprep.subr.mxu0 %v1284_v14 }
  0x1d   :  { %265 = vmatpush1.msra.mxu1 %v1280_v13  ;;  %156 = vmatpush1.msra.mxu0 %v1288_v15 }
  0x1e   :  { %266 = vmatprep.subr.mxu1 %v1284_v14  ;;  %157 = vmatprep.subr.mxu0 %v1292_v16 }
  0x1f   :  { %267 = vmatpush1.msra.mxu1 %v1288_v15  ;;  %158 = vmatpush1.msra.mxu0 %v1296_v17 }
  0x20   :  { %268 = vmatprep.subr.mxu1 %v1292_v16  ;;  %159 = vmatprep.subr.mxu0 %v1300_v18 }
  0x21   :  { %269 = vmatpush1.msra.mxu1 %v1296_v17  ;;  %160 = vmatpush1.msra.mxu0 %v1304_v19 }
  0x22   :  { %270 = vmatprep.subr.mxu1 %v1300_v18  ;;  %194 = vmatmul.mubr.f32.vlgmr.msra.gmra.mxu0 %v1181_v1 }
  0x23   :  { %271 = vmatpush1.msra.mxu1 %v1304_v19  ;;  %367 = vmatprep.subr.mxu0 %v1244_v3 }
  0x24   :  { %415 = vmatprep.mubr.f32.mxu0 %v1181_v1  ;;  %368 = vmatpush1.msra.mxu0 %v1246_v4 }
  0x25   :  { %478 = vmatprep.subr.mxu1 %v1244_v3  ;;  %369 = vmatprep.subr.mxu0 %v1248_v5 }
  0x26   :  { %370 = vmatpush1.msra.mxu0 %v1251_v6  ;;  %1069 = vset.pattern.permute.xlu1 %v1184_v61 }
  0x27   :  { %371 = vmatprep.subr.mxu0 %v1255_v7 }
  0x28   :  { %372 = vmatpush1.msra.mxu0 %v1259_v8 }
  0x29   :  { %373 = vmatprep.subr.mxu0 %v1263_v9 }
  0x2a   :  { %374 = vmatpush1.msra.mxu0 %v1267_v10 }
  0x2b   :  { %375 = vmatprep.subr.mxu0 %v1276_v12 }
  0x2c   :  { %376 = vmatpush1.msra.mxu0 %v1280_v13 }
  0x2d   :  { %377 = vmatprep.subr.mxu0 %v1284_v14 }
  0x2e   :  { %378 = vmatpush1.msra.mxu0 %v1288_v15 }
  0x2f   :  { %379 = vmatprep.subr.mxu0 %v1292_v16 }
  0x30   :  { %380 = vmatpush1.msra.mxu0 %v1296_v17 }
  0x31   :  { %381 = vmatprep.subr.mxu0 %v1300_v18 }
  0x32   :  { %382 = vmatpush1.msra.mxu0 %v1304_v19 }
  0x33   :  { %589 = vmatprep.subr.mxu0 %v1244_v3 }
  0x93   :  { %v119_v26 = vpop.permute.xlu0 %118 }
  0x94   :  { %v121_v29 = vmul.f32 %v119_v26, %v1337_v25  ;;  %v122_v31 = vmul.f32 %v119_v26, %v1342_v28 }
  0x96   :  { %v123_v33 = vadd.f32 %v121_v29, %v1345_v30  ;;  %v124_v34 = vadd.f32 %v122_v31, %v1348_v32 }
  0xe2   :  { %v195_v35 = vpop.f32.mrf.mxu0 }
  0xe3   :  { %v200_v36 = vadd.f32 %v195_v35, %v123_v33 }
  0xe4   :  { %v197_v37 = vpop.f32.mrf.mxu0 }
  0xe5   :  { %v1031_v38 = vmul.f32 -1.442695, %v200_v36  ;;  %v201_v39 = vadd.f32 %v197_v37, %v124_v34 }
  0xe7   :  { %1076 = vpow2.f32 %v1031_v38  ;;  %v1032_v40 = vmul.f32 -1.442695, %v201_v39 }
  0xe9   :  { %1078 = vpow2.f32 %v1032_v40 }
  0xf4   :  { %v1077_v41 = vpop.eup %1076 }
  0xf5   :  { %v208_v42 = vadd.f32 1.0, %v1077_v41 }
  0xf6   :  { %v1079_v43 = vpop.eup %1078 }
  0xf7   :  { %1080 = vrcp.f32 %v208_v42  ;;  %v209_v44 = vadd.f32 1.0, %v1079_v43 }
  0xf9   :  { %1082 = vrcp.f32 %v209_v44 }
 0x104   :  { %v1081_v49 = vpop.eup %1080 }
 0x105   :  { %v214_v52 = vmul.f32 %v1081_v49, %v1355_v46 }
 0x106   :  { %v1083_v53 = vpop.eup %1082 }
 0x107   :  { %v215_v54 = vmul.f32 %v1083_v53, %v1360_v48  ;;  %v216_v55 = vadd.f32 %v214_v52, %v1362_v50  ;;  %v1185_v52 = vmov 2  }
 0x108   :  { %1070 = vset.pattern.permute.xlu0 %v1185_v52 }
 0x109   :  { %v217_v56 = vadd.f32 %v215_v54, %v1364_v51  ;;  %v218_v58 = vmul.f32 0.0, %v216_v55 }
 0x10b   :  { %v219_v57 = vmul.f32 %v217_v56, %v216_v55 }
 0x10d   :  { %221 = vrot.lane.b32.xlu0 %v219_v57, %s1183_s4 }
 0x17f   :  { %v222_v59 = vpop.permute.xlu0 %221 }
 0x180   :  { %v224_v60 = vadd.f32 %v222_v59, %v218_v58 }
 0x182   :  { %1084 = vtanh.f32 %v224_v60 }
 0x18f   :  { %v1085_v62 = vpop.eup %1084 }
 0x190   :  { %v226_v63 = vmul.f32 %v1085_v62, %v217_v56 }
 0x192   :  { %236 = vrot.lane.b32.xlu1 %v226_v63, %s1183_s4 }
 0x196   :  { %228 = vperm.xlu1 %1069, %v1272_v11  }
 0x204   :  { %v237_v0 = vpop.permute.xlu1 %236 }
 0x205   :  { %1033 = vmatmul.mubr.msk.f32.vlgmr.msra.gmra.mxu1 %vm125_vm0, %v237_v0 }
 0x206   :  { %479 = vmatpush1.msra.mxu1 %v1246_v4  ;;  %526 = vmatprep.mubr.f32.mxu1 %v1181_v1 }
 0x207   :  { %480 = vmatprep.subr.mxu1 %v1248_v5 }
 0x208   :  { %481 = vmatpush1.msra.mxu1 %v1251_v6 }
 0x209   :  { %482 = vmatprep.subr.mxu1 %v1255_v7 }
 0x20a   :  { %483 = vmatpush1.msra.mxu1 %v1259_v8 }
 0x20b   :  { %484 = vmatprep.subr.mxu1 %v1263_v9 }
 0x20c   :  { %485 = vmatpush1.msra.mxu1 %v1267_v10 }
 0x20d   :  { %486 = vmatprep.subr.mxu1 %v1276_v12 }
 0x20e   :  { %487 = vmatpush1.msra.mxu1 %v1280_v13 }
 0x20f   :  { %488 = vmatprep.subr.mxu1 %v1284_v14 }
 0x210   :  { %489 = vmatpush1.msra.mxu1 %v1288_v15 }
 0x211   :  { %490 = vmatprep.subr.mxu1 %v1292_v16  ;;  %v229_v2 = vpop.permute.xlu1 %228 }
 0x212   :  { %491 = vmatpush1.msra.mxu1 %v1296_v17  ;;  %v231_v20 = vmul.f32 %v229_v2, %v1337_v25  ;;  %v232_v21 = vmul.f32 %v229_v2, %v1342_v28 }
 0x213   :  { %492 = vmatprep.subr.mxu1 %v1300_v18 }
 0x214   :  { %493 = vmatpush1.msra.mxu1 %v1304_v19  ;;  %v233_v22 = vadd.f32 %v231_v20, %v1345_v30  ;;  %v234_v23 = vadd.f32 %v232_v21, %v1348_v32 }
 0x215   :  { %700 = vmatprep.subr.mxu1 %v1244_v3 }
 0x2c5   :  { %v306_v24 = vpop.f32.mrf.mxu1 }
 0x2c6   :  { %v311_v26 = vadd.f32 %v306_v24, %v233_v22 }
 0x2c7   :  { %v308_v27 = vpop.f32.mrf.mxu1 }
 0x2c8   :  { %v1034_v29 = vmul.f32 -1.442695, %v311_v26  ;;  %v312_v31 = vadd.f32 %v308_v27, %v234_v23 }
 0x2ca   :  { %1086 = vpow2.f32 %v1034_v29  ;;  %v1035_v33 = vmul.f32 -1.442695, %v312_v31 }
 0x2cc   :  { %1088 = vpow2.f32 %v1035_v33 }
 0x2d7   :  { %v1087_v34 = vpop.eup %1086 }
 0x2d8   :  { %v319_v35 = vadd.f32 1.0, %v1087_v34 }
 0x2d9   :  { %v1089_v36 = vpop.eup %1088 }
 0x2da   :  { %1090 = vrcp.f32 %v319_v35  ;;  %v320_v37 = vadd.f32 1.0, %v1089_v36 }
 0x2dc   :  { %1092 = vrcp.f32 %v320_v37 }
 0x2e7   :  { %v1091_v38 = vpop.eup %1090 }
 0x2e8   :  { %v325_v39 = vmul.f32 %v1091_v38, %v1355_v46 }
 0x2e9   :  { %v1093_v40 = vpop.eup %1092 }
 0x2ea   :  { %v326_v41 = vmul.f32 %v1093_v40, %v1360_v48  ;;  %v327_v42 = vadd.f32 %v325_v39, %v1362_v50  ;;  %v1186_v39 = vmov 3  }
 0x2ec   :  { %v328_v43 = vadd.f32 %v326_v41, %v1364_v51  ;;  %v329_v45 = vmul.f32 %v327_v42, %v224_v60 }
 0x2ee   :  { %v330_v44 = vmul.f32 %v328_v43, %v327_v42 }
 0x2f0   :  { %332 = vrot.lane.b32.xlu0 %v330_v44, %s1183_s4 }
 0x2f4   :  { %339 = vperm.xlu0 %1070, %v1272_v11  }
 0x2f8   :  { %1071 = vset.pattern.permute.xlu0 %v1186_v39 }
 0x2f9   :  { %450 = vperm.xlu0 %1071, %v1272_v11  }
 0x362   :  { %v333_v47 = vpop.permute.xlu0 %332 }
 0x363   :  { %v335_v49 = vadd.f32 %v333_v47, %v329_v45 }
 0x365   :  { %1094 = vtanh.f32 %v335_v49 }
 0x36f   :  { %v340_v56 = vpop.permute.xlu0 %339 }
 0x370   :  { %v342_v57 = vmul.f32 %v340_v56, %v1337_v25  ;;  %v343_v58 = vmul.f32 %v340_v56, %v1342_v28 }
 0x372   :  { %v1095_v53 = vpop.eup %1094  ;;  %v344_v59 = vadd.f32 %v342_v57, %v1345_v30  ;;  %v345_v60 = vadd.f32 %v343_v58, %v1348_v32 }
 0x373   :  { %v337_v54 = vmul.f32 %v1095_v53, %v328_v43 }
 0x374   :  { %v451_v43 = vpop.permute.xlu0 %450 }
 0x375   :  { %347 = vrot.lane.b32.xlu1 %v337_v54, %s1183_s4  ;;  %v453_v44 = vmul.f32 %v451_v43, %v1337_v25  ;;  %v454_v45 = vmul.f32 %v451_v43, %v1342_v28 }
 0x377   :  { %v455_v47 = vadd.f32 %v453_v44, %v1345_v30 }
 0x3e7   :  { %v348_v55 = vpop.permute.xlu1 %347 }
 0x3e8   :  { %1036 = vmatmul.mubr.msk.f32.vlgmr.msra.gmra.mxu0 %vm125_vm0, %v348_v55 }
 0x3e9   :  { %590 = vmatpush1.msra.mxu0 %v1246_v4  ;;  %637 = vmatprep.mubr.f32.mxu0 %v1181_v1 }
 0x3ea   :  { %591 = vmatprep.subr.mxu0 %v1248_v5 }
 0x3eb   :  { %592 = vmatpush1.msra.mxu0 %v1251_v6 }
 0x3ec   :  { %593 = vmatprep.subr.mxu0 %v1255_v7 }
 0x3ed   :  { %594 = vmatpush1.msra.mxu0 %v1259_v8 }
 0x3ee   :  { %595 = vmatprep.subr.mxu0 %v1263_v9 }
 0x3ef   :  { %596 = vmatpush1.msra.mxu0 %v1267_v10 }
 0x3f0   :  { %597 = vmatprep.subr.mxu0 %v1276_v12 }
 0x3f1   :  { %598 = vmatpush1.msra.mxu0 %v1280_v13 }
 0x3f2   :  { %599 = vmatprep.subr.mxu0 %v1284_v14 }
 0x3f3   :  { %600 = vmatpush1.msra.mxu0 %v1288_v15 }
 0x3f4   :  { %601 = vmatprep.subr.mxu0 %v1292_v16 }
 0x3f5   :  { %602 = vmatpush1.msra.mxu0 %v1296_v17 }
 0x3f6   :  { %603 = vmatprep.subr.mxu0 %v1300_v18 }
 0x3f7   :  { %604 = vmatpush1.msra.mxu0 %v1304_v19 }
 0x3f8   :  { %811 = vmatprep.subr.mxu0 %v1244_v3 }
 0x4a8   :  { %v417_v61 = vpop.f32.mrf.mxu0 }
 0x4a9   :  { %v422_v62 = vadd.f32 %v417_v61, %v344_v59 }
 0x4aa   :  { %v419_v63 = vpop.f32.mrf.mxu0 }
 0x4ab   :  { %v1037_v0 = vmul.f32 -1.442695, %v422_v62  ;;  %v423_v2 = vadd.f32 %v419_v63, %v345_v60 }
 0x4ad   :  { %1096 = vpow2.f32 %v1037_v0  ;;  %v1038_v20 = vmul.f32 -1.442695, %v423_v2 }
 0x4af   :  { %1098 = vpow2.f32 %v1038_v20 }
 0x4ba   :  { %v1097_v21 = vpop.eup %1096 }
 0x4bb   :  { %v430_v22 = vadd.f32 1.0, %v1097_v21 }
 0x4bc   :  { %v1099_v23 = vpop.eup %1098 }
 0x4bd   :  { %1100 = vrcp.f32 %v430_v22  ;;  %v431_v24 = vadd.f32 1.0, %v1099_v23 }
 0x4bf   :  { %1102 = vrcp.f32 %v431_v24 }
 0x4ca   :  { %v1101_v26 = vpop.eup %1100 }
 0x4cb   :  { %v436_v27 = vmul.f32 %v1101_v26, %v1355_v46  ;;  %v1187_v26 = vmov 4  }
 0x4cc   :  { %v1103_v29 = vpop.eup %1102  ;;  %1072 = vset.pattern.permute.xlu0 %v1187_v26 }
 0x4cd   :  { %v437_v31 = vmul.f32 %v1103_v29, %v1360_v48  ;;  %v438_v33 = vadd.f32 %v436_v27, %v1362_v50  ;;  %561 = vperm.xlu0 %1072, %v1272_v11  }
 0x4cf   :  { %v439_v34 = vadd.f32 %v437_v31, %v1364_v51  ;;  %v440_v36 = vmul.f32 %v438_v33, %v335_v49  ;;  %v456_v49 = vadd.f32 %v454_v45, %v1348_v32 }
 0x4d1   :  { %v441_v35 = vmul.f32 %v439_v34, %v438_v33 }
 0x4d3   :  { %443 = vrot.lane.b32.xlu1 %v441_v35, %s1183_s4 }
 0x545   :  { %v444_v37 = vpop.permute.xlu1 %443 }
 0x546   :  { %v446_v38 = vadd.f32 %v444_v37, %v440_v36 }
 0x548   :  { %1104 = vtanh.f32 %v446_v38  ;;  %v562_v33 = vpop.permute.xlu0 %561 }
 0x549   :  { %v565_v35 = vmul.f32 %v562_v33, %v1342_v28 }
 0x54b   :  { %v567_v37 = vadd.f32 %v565_v35, %v1348_v32 }
 0x555   :  { %v1105_v40 = vpop.eup %1104 }
 0x556   :  { %v448_v41 = vmul.f32 %v1105_v40, %v439_v34  ;;  %v564_v34 = vmul.f32 %v562_v33, %v1337_v25 }
 0x558   :  { %458 = vrot.lane.b32.xlu1 %v448_v41, %s1183_s4  ;;  %v566_v36 = vadd.f32 %v564_v34, %v1345_v30 }
 0x5ca   :  { %v459_v42 = vpop.permute.xlu1 %458 }
 0x5cb   :  { %1039 = vmatmul.mubr.msk.f32.vlgmr.msra.gmra.mxu1 %vm125_vm0, %v459_v42 }
 0x5cc   :  { %701 = vmatpush1.msra.mxu1 %v1246_v4  ;;  %748 = vmatprep.mubr.f32.mxu1 %v1181_v1 }
 0x5cd   :  { %702 = vmatprep.subr.mxu1 %v1248_v5 }
 0x5ce   :  { %703 = vmatpush1.msra.mxu1 %v1251_v6 }
 0x5cf   :  { %704 = vmatprep.subr.mxu1 %v1255_v7 }
 0x5d0   :  { %705 = vmatpush1.msra.mxu1 %v1259_v8 }
 0x5d1   :  { %706 = vmatprep.subr.mxu1 %v1263_v9 }
 0x5d2   :  { %707 = vmatpush1.msra.mxu1 %v1267_v10 }
 0x5d3   :  { %708 = vmatprep.subr.mxu1 %v1276_v12 }
 0x5d4   :  { %709 = vmatpush1.msra.mxu1 %v1280_v13 }
 0x5d5   :  { %710 = vmatprep.subr.mxu1 %v1284_v14 }
 0x5d6   :  { %711 = vmatpush1.msra.mxu1 %v1288_v15 }
 0x5d7   :  { %712 = vmatprep.subr.mxu1 %v1292_v16 }
 0x5d8   :  { %713 = vmatpush1.msra.mxu1 %v1296_v17 }
 0x5d9   :  { %714 = vmatprep.subr.mxu1 %v1300_v18 }
 0x5da   :  { %715 = vmatpush1.msra.mxu1 %v1304_v19 }
 0x5db   :  { %922 = vmatprep.subr.mxu1 %v1244_v3 }
 0x68b   :  { %v528_v52 = vpop.f32.mrf.mxu1 }
 0x68c   :  { %v533_v53 = vadd.f32 %v528_v52, %v455_v47 }
 0x68d   :  { %v530_v54 = vpop.f32.mrf.mxu1 }
 0x68e   :  { %v1040_v55 = vmul.f32 -1.442695, %v533_v53  ;;  %v534_v56 = vadd.f32 %v530_v54, %v456_v49 }
 0x690   :  { %1106 = vpow2.f32 %v1040_v55  ;;  %v1041_v57 = vmul.f32 -1.442695, %v534_v56 }
 0x692   :  { %1108 = vpow2.f32 %v1041_v57 }
 0x69d   :  { %v1107_v58 = vpop.eup %1106 }
 0x69e   :  { %v541_v59 = vadd.f32 1.0, %v1107_v58 }
 0x69f   :  { %v1109_v3 = vpop.eup %1108 }
 0x6a0   :  { %1110 = vrcp.f32 %v541_v59  ;;  %v542_v60 = vadd.f32 1.0, %v1109_v3 }
 0x6a2   :  { %1112 = vrcp.f32 %v542_v60 }
 0x6ad   :  { %v1111_v61 = vpop.eup %1110 }
 0x6ae   :  { %v547_v62 = vmul.f32 %v1111_v61, %v1355_v46  ;;  %v1188_v61 = vmov 5  }
 0x6af   :  { %v1113_v63 = vpop.eup %1112  ;;  %1073 = vset.pattern.permute.xlu0 %v1188_v61 }
 0x6b0   :  { %v548_v0 = vmul.f32 %v1113_v63, %v1360_v48  ;;  %v549_v2 = vadd.f32 %v547_v62, %v1362_v50  ;;  %672 = vperm.xlu0 %1073, %v1272_v11  }
 0x6b2   :  { %v550_v20 = vadd.f32 %v548_v0, %v1364_v51  ;;  %v551_v22 = vmul.f32 %v549_v2, %v446_v38 }
 0x6b4   :  { %v552_v21 = vmul.f32 %v550_v20, %v549_v2 }
 0x6b6   :  { %554 = vrot.lane.b32.xlu1 %v552_v21, %s1183_s4 }
 0x728   :  { %v555_v23 = vpop.permute.xlu1 %554 }
 0x729   :  { %v557_v24 = vadd.f32 %v555_v23, %v551_v22 }
 0x72b   :  { %1114 = vtanh.f32 %v557_v24 }
 0x738   :  { %v1115_v27 = vpop.eup %1114 }
 0x739   :  { %v559_v29 = vmul.f32 %v1115_v27, %v550_v20 }
 0x73b   :  { %569 = vrot.lane.b32.xlu1 %v559_v29, %s1183_s4 }
 0x7ad   :  { %v570_v31 = vpop.permute.xlu1 %569 }
 0x7ae   :  { %1042 = vmatmul.mubr.msk.f32.vlgmr.msra.gmra.mxu0 %vm125_vm0, %v570_v31  ;;  %v1189_v31 = vmov 6  }
 0x7af   :  { %812 = vmatpush1.msra.mxu0 %v1246_v4  ;;  %859 = vmatprep.mubr.f32.mxu0 %v1181_v1 }
 0x7b0   :  { %813 = vmatprep.subr.mxu0 %v1248_v5  ;;  %1074 = vset.pattern.permute.xlu0 %v1189_v31 }
 0x7b1   :  { %814 = vmatpush1.msra.mxu0 %v1251_v6  ;;  %783 = vperm.xlu0 %1074, %v1272_v11  }
 0x7b2   :  { %815 = vmatprep.subr.mxu0 %v1255_v7 }
 0x7b3   :  { %816 = vmatpush1.msra.mxu0 %v1259_v8 }
 0x7b4   :  { %817 = vmatprep.subr.mxu0 %v1263_v9 }
 0x7b5   :  { %818 = vmatpush1.msra.mxu0 %v1267_v10 }
 0x7b6   :  { %819 = vmatprep.subr.mxu0 %v1276_v12 }
 0x7b7   :  { %820 = vmatpush1.msra.mxu0 %v1280_v13 }
 0x7b8   :  { %821 = vmatprep.subr.mxu0 %v1284_v14 }
 0x7b9   :  { %822 = vmatpush1.msra.mxu0 %v1288_v15 }
 0x7ba   :  { %823 = vmatprep.subr.mxu0 %v1292_v16 }
 0x7bb   :  { %824 = vmatpush1.msra.mxu0 %v1296_v17 }
 0x7bc   :  { %825 = vmatprep.subr.mxu0 %v1300_v18 }
 0x7bd   :  { %826 = vmatpush1.msra.mxu0 %v1304_v19 }
 0x86e   :  { %v639_v38 = vpop.f32.mrf.mxu0 }
 0x86f   :  { %v644_v39 = vadd.f32 %v639_v38, %v566_v36 }
 0x870   :  { %v641_v40 = vpop.f32.mrf.mxu0 }
 0x871   :  { %v1043_v41 = vmul.f32 -1.442695, %v644_v39  ;;  %v645_v42 = vadd.f32 %v641_v40, %v567_v37 }
 0x873   :  { %1116 = vpow2.f32 %v1043_v41  ;;  %v1044_v43 = vmul.f32 -1.442695, %v645_v42 }
 0x875   :  { %1118 = vpow2.f32 %v1044_v43 }
 0x880   :  { %v1117_v44 = vpop.eup %1116 }
 0x881   :  { %v652_v45 = vadd.f32 1.0, %v1117_v44 }
 0x882   :  { %v1119_v47 = vpop.eup %1118 }
 0x883   :  { %1120 = vrcp.f32 %v652_v45  ;;  %v653_v49 = vadd.f32 1.0, %v1119_v47 }
 0x885   :  { %1122 = vrcp.f32 %v653_v49 }
 0x890   :  { %v1121_v52 = vpop.eup %1120 }
 0x891   :  { %v658_v53 = vmul.f32 %v1121_v52, %v1355_v46 }
 0x892   :  { %v1123_v54 = vpop.eup %1122 }
 0x893   :  { %v659_v55 = vmul.f32 %v1123_v54, %v1360_v48  ;;  %v660_v56 = vadd.f32 %v658_v53, %v1362_v50 }
 0x895   :  { %v661_v57 = vadd.f32 %v659_v55, %v1364_v51  ;;  %v662_v59 = vmul.f32 %v660_v56, %v557_v24 }
 0x897   :  { %v663_v58 = vmul.f32 %v661_v57, %v660_v56 }
 0x899   :  { %665 = vrot.lane.b32.xlu1 %v663_v58, %s1183_s4 }
 0x90b   :  { %v666_v3 = vpop.permute.xlu1 %665 }
 0x90c   :  { %v668_v60 = vadd.f32 %v666_v3, %v662_v59 }
 0x90e   :  { %1124 = vtanh.f32 %v668_v60 }
 0x91b   :  { %v1125_v62 = vpop.eup %1124 }
 0x91c   :  { %v670_v63 = vmul.f32 %v1125_v62, %v661_v57 }
 0x91e   :  { %680 = vrot.lane.b32.xlu1 %v670_v63, %s1183_s4 }
 0x990   :  { %v681_v0 = vpop.permute.xlu1 %680 }
 0x991   :  { %1045 = vmatmul.mubr.msk.f32.vlgmr.msra.gmra.mxu1 %vm125_vm0, %v681_v0  ;;  %v1190_v0 = vmov 7  }
 0x992   :  { %923 = vmatpush1.msra.mxu1 %v1246_v4  ;;  %970 = vmatprep.mubr.f32.mxu1 %v1181_v1  ;;  %v673_v1 = vpop.permute.xlu0 %672 }
 0x993   :  { %924 = vmatprep.subr.mxu1 %v1248_v5  ;;  %v675_v4 = vmul.f32 %v673_v1, %v1337_v25  ;;  %v676_v5 = vmul.f32 %v673_v1, %v1342_v28  ;;  %1075 = vset.pattern.permute.xlu0 %v1190_v0 }
 0x994   :  { %925 = vmatpush1.msra.mxu1 %v1251_v6  ;;  %894 = vperm.xlu0 %1075, %v1272_v11  }
 0x995   :  { %926 = vmatprep.subr.mxu1 %v1255_v7  ;;  %v677_v6 = vadd.f32 %v675_v4, %v1345_v30  ;;  %v678_v7 = vadd.f32 %v676_v5, %v1348_v32 }
 0x996   :  { %927 = vmatpush1.msra.mxu1 %v1259_v8  ;;  %v784_v36 = vpop.permute.xlu0 %783 }
 0x997   :  { %928 = vmatprep.subr.mxu1 %v1263_v9  ;;  %v786_v37 = vmul.f32 %v784_v36, %v1337_v25  ;;  %v787_v38 = vmul.f32 %v784_v36, %v1342_v28 }
 0x998   :  { %929 = vmatpush1.msra.mxu1 %v1267_v10 }
 0x999   :  { %930 = vmatprep.subr.mxu1 %v1276_v12  ;;  %v788_v39 = vadd.f32 %v786_v37, %v1345_v30  ;;  %v789_v40 = vadd.f32 %v787_v38, %v1348_v32 }
 0x99a   :  { %931 = vmatpush1.msra.mxu1 %v1280_v13 }
 0x99b   :  { %932 = vmatprep.subr.mxu1 %v1284_v14 }
 0x99c   :  { %933 = vmatpush1.msra.mxu1 %v1288_v15 }
 0x99d   :  { %934 = vmatprep.subr.mxu1 %v1292_v16 }
 0x99e   :  { %935 = vmatpush1.msra.mxu1 %v1296_v17 }
 0x99f   :  { %936 = vmatprep.subr.mxu1 %v1300_v18 }
 0x9a0   :  { %937 = vmatpush1.msra.mxu1 %v1304_v19 }
 0xa51   :  { %v750_v8 = vpop.f32.mrf.mxu1 }
 0xa52   :  { %v755_v9 = vadd.f32 %v750_v8, %v677_v6  ;;  %v895_v6 = vpop.permute.xlu0 %894 }
 0xa53   :  { %v752_v10 = vpop.f32.mrf.mxu1  ;;  %v898_v8 = vmul.f32 %v895_v6, %v1342_v28 }
 0xa54   :  { %v1046_v12 = vmul.f32 -1.442695, %v755_v9  ;;  %v756_v13 = vadd.f32 %v752_v10, %v678_v7  ;;  %v897_v7 = vmul.f32 %v895_v6, %v1337_v25 }
 0xa55   :  { %v900_v10 = vadd.f32 %v898_v8, %v1348_v32 }
 0xa56   :  { %1126 = vpow2.f32 %v1046_v12  ;;  %v1047_v14 = vmul.f32 -1.442695, %v756_v13  ;;  %v899_v9 = vadd.f32 %v897_v7, %v1345_v30 }
 0xa58   :  { %1128 = vpow2.f32 %v1047_v14 }
 0xa63   :  { %v1127_v15 = vpop.eup %1126 }
 0xa64   :  { %v763_v16 = vadd.f32 1.0, %v1127_v15 }
 0xa65   :  { %v1129_v17 = vpop.eup %1128 }
 0xa66   :  { %1130 = vrcp.f32 %v763_v16  ;;  %v764_v18 = vadd.f32 1.0, %v1129_v17 }
 0xa68   :  { %1132 = vrcp.f32 %v764_v18 }
 0xa73   :  { %v1131_v19 = vpop.eup %1130 }
 0xa74   :  { %v769_v2 = vmul.f32 %v1131_v19, %v1355_v46 }
 0xa75   :  { %v1133_v20 = vpop.eup %1132 }
 0xa76   :  { %v770_v21 = vmul.f32 %v1133_v20, %v1360_v48  ;;  %v771_v22 = vadd.f32 %v769_v2, %v1362_v50 }
 0xa78   :  { %v772_v23 = vadd.f32 %v770_v21, %v1364_v51  ;;  %v773_v26 = vmul.f32 %v771_v22, %v668_v60 }
 0xa7a   :  { %v774_v24 = vmul.f32 %v772_v23, %v771_v22 }
 0xa7c   :  { %776 = vrot.lane.b32.xlu1 %v774_v24, %s1183_s4 }
 0xaee   :  { %v777_v27 = vpop.permute.xlu1 %776 }
 0xaef   :  { %v779_v29 = vadd.f32 %v777_v27, %v773_v26 }
 0xaf1   :  { %1134 = vtanh.f32 %v779_v29 }
 0xafe   :  { %v1135_v33 = vpop.eup %1134 }
 0xaff   :  { %v781_v34 = vmul.f32 %v1135_v33, %v772_v23  ;;  %v1030_v23 = vld [vmem:[%s1553_s6] ss:$0 sm:$0xff] }
 0xb00   :  { %v1054_v33 = vld [vmem:[#allocation2] ss:$0 sm:$0xff] }
 0xb01   :  { %791 = vrot.lane.b32.xlu1 %v781_v34, %s1183_s4 }
 0xb73   :  { %v792_v35 = vpop.permute.xlu1 %791 }
 0xb74   :  { %1048 = vmatmul.mubr.msk.f32.vlgmr.msra.gmra.mxu0 %vm125_vm0, %v792_v35 }
 0xc34   :  { %v861_v41 = vpop.f32.mrf.mxu0 }
 0xc35   :  { %v866_v42 = vadd.f32 %v861_v41, %v788_v39 }
 0xc36   :  { %v863_v43 = vpop.f32.mrf.mxu0 }
 0xc37   :  { %v1049_v44 = vmul.f32 -1.442695, %v866_v42  ;;  %v867_v45 = vadd.f32 %v863_v43, %v789_v40 }
 0xc39   :  { %1136 = vpow2.f32 %v1049_v44  ;;  %v1050_v47 = vmul.f32 -1.442695, %v867_v45 }
 0xc3b   :  { %1138 = vpow2.f32 %v1050_v47 }
 0xc46   :  { %v1137_v49 = vpop.eup %1136 }
 0xc47   :  { %v874_v52 = vadd.f32 1.0, %v1137_v49 }
 0xc48   :  { %v1139_v53 = vpop.eup %1138 }
 0xc49   :  { %1140 = vrcp.f32 %v874_v52  ;;  %v875_v54 = vadd.f32 1.0, %v1139_v53 }
 0xc4b   :  { %1142 = vrcp.f32 %v875_v54 }
 0xc56   :  { %v1141_v55 = vpop.eup %1140 }
 0xc57   :  { %v880_v56 = vmul.f32 %v1141_v55, %v1355_v46 }
 0xc58   :  { %v1143_v57 = vpop.eup %1142 }
 0xc59   :  { %v881_v58 = vmul.f32 %v1143_v57, %v1360_v48  ;;  %v882_v59 = vadd.f32 %v880_v56, %v1362_v50 }
 0xc5b   :  { %v883_v3 = vadd.f32 %v881_v58, %v1364_v51  ;;  %v884_v61 = vmul.f32 %v882_v59, %v779_v29 }
 0xc5d   :  { %v885_v60 = vmul.f32 %v883_v3, %v882_v59 }
 0xc5f   :  { %887 = vrot.lane.b32.xlu1 %v885_v60, %s1183_s4 }
 0xcd1   :  { %v888_v62 = vpop.permute.xlu1 %887 }
 0xcd2   :  { %v890_v63 = vadd.f32 %v888_v62, %v884_v61 }
 0xcd4   :  { %1144 = vtanh.f32 %v890_v63 }
 0xce1   :  { %v1145_v1 = vpop.eup %1144 }
 0xce2   :  { %v892_v4 = vmul.f32 %v1145_v1, %v883_v3 }
 0xce4   :  { %902 = vrot.lane.b32.xlu1 %v892_v4, %s1183_s4 }
 0xd56   :  { %v903_v5 = vpop.permute.xlu1 %902 }
 0xd57   :  { %1051 = vmatmul.mubr.msk.f32.vlgmr.msra.gmra.mxu1 %vm125_vm0, %v903_v5 }
 0xe17   :  { %v972_v12 = vpop.f32.mrf.mxu1 }
 0xe18   :  { %v977_v13 = vadd.f32 %v972_v12, %v899_v9 }
 0xe19   :  { %v974_v14 = vpop.f32.mrf.mxu1 }
 0xe1a   :  { %v1052_v11 = vmul.f32 -1.442695, %v977_v13  ;;  %v978_v15 = vadd.f32 %v974_v14, %v900_v10 }
 0xe1c   :  { %1146 = vpow2.f32 %v1052_v11  ;;  %v1053_v16 = vmul.f32 -1.442695, %v978_v15 }
 0xe1e   :  { %1148 = vpow2.f32 %v1053_v16 }
 0xe29   :  { %v1147_v17 = vpop.eup %1146 }
 0xe2a   :  { %v985_v18 = vadd.f32 1.0, %v1147_v17 }
 0xe2b   :  { %v1149_v19 = vpop.eup %1148 }
 0xe2c   :  { %1150 = vrcp.f32 %v985_v18  ;;  %v986_v2 = vadd.f32 1.0, %v1149_v19 }
 0xe2e   :  { %1152 = vrcp.f32 %v986_v2 }
 0xe39   :  { %v1151_v25 = vpop.eup %1150 }
 0xe3a   :  { %v991_v28 = vmul.f32 %v1151_v25, %v1355_v46 }
 0xe3b   :  { %v1153_v30 = vpop.eup %1152 }
 0xe3c   :  { %v992_v32 = vmul.f32 %v1153_v30, %v1360_v48  ;;  %v993_v20 = vadd.f32 %v991_v28, %v1362_v50 }
 0xe3e   :  { %v994_v21 = vadd.f32 %v992_v32, %v1364_v51  ;;  %v995_v24 = vmul.f32 %v993_v20, %v890_v63 }
 0xe40   :  { %v996_v22 = vmul.f32 %v994_v21, %v993_v20 }
 0xe42   :  { %998 = vrot.lane.b32.xlu1 %v996_v22, %s1183_s4 }
 0xe46   :  { %1004 = vrot.lane.b32.xlu1 %v1030_v23, %s1183_s4 }
 0xeb4   :  { %v999_v26 = vpop.permute.xlu1 %998 }
 0xeb5   :  { %v1001_v27 = vadd.f32 %v999_v26, %v995_v24 }
 0xeb7   :  { %1154 = vtanh.f32 %v1001_v27 }
 0xeb8   :  { %v1005_v29 = vpop.permute.xlu1 %1004 }
 0xec4   :  { %v1155_v46 = vpop.eup %1154 }
 0xec5   :  { %v1003_v48 = vmul.f32 %v1155_v46, %v994_v21 }
 0xec7   :  { %v1007_v31 = vmul.f32 %v1005_v29, %v1003_v48 }
 0xec9   :  { %1009 = vrot.lane.b32.xlu0 %v1007_v31, %s1183_s4 }
 0xf3b   :  { %v1010_v50 = vpop.permute.xlu0 %1009 }
 0xf3c   :  { %v1012_v51 = vsel %vm125_vm0, %v1010_v50, 0.0 }
 0xf3d   :  { %1013 = vadd.xlane.f32.xlu1 %v1012_v51 }
 0xfc6   :  { %v1014_v34 = vpop.xlane.xlu1 %1013 }
 0xfc7   :  { %v1022_v35 = vadd.f32 %v1054_v33, %v1014_v34 }
 0xfc9   :  { %1024 = vst.msk [vmem:[%s1555_s8] sm:$0xff] %vm1023_vm1, %v1022_v35 }
 0xfca   :  { %1029 = vsyncpa [#allocation4], 1 }

</bundles_post_ra>
